<compile_context>
chip_gen: v6e
topology: v6e:2x2x1
jax: 0.10.0
libtpu: 0.0.40
codegen_flags: <defaults>
</compile_context>

<pallas_src>
import jax
import jax.numpy as jnp
from jax.experimental import pallas as pl
from jax.experimental.pallas import tpu as pltpu

MLP_SCALE = 4
LN_EPS = 1e-5
_GELU_C = 0.7978845608028654  # sqrt(2/pi)


def _vanilla_execute_kernel(x_ref, attn_ref, gamma_ref, beta_ref,
                            w1_ref, b1_ref, w2_ref, o_ref,
                            ln_ref, acc_ref):
    h = pl.program_id(1)
    nh = pl.num_programs(1)

    # ---- first hidden tile: residual add + LayerNorm; seed the accumulator with attn ----
    @pl.when(h == 0)
    def _():
        x = x_ref[...].astype(jnp.float32)
        attn = attn_ref[...].astype(jnp.float32)
        s = x + attn
        mean = jnp.mean(s, axis=-1, keepdims=True)
        cent = s - mean
        var = jnp.mean(cent * cent, axis=-1, keepdims=True)
        inp = cent * jax.lax.rsqrt(var + LN_EPS)
        inp = inp * gamma_ref[...].astype(jnp.float32) + beta_ref[...].astype(jnp.float32)
        # Cache LN output once, already in the matmul operand dtype (bf16 weights =>
        # bf16 cache + bf16 MXU path; f32 weights => f32).
        ln_ref[...] = inp.astype(ln_ref.dtype)
        # Fold the trailing `mlp + attn` residual into the accumulator init.
        acc_ref[...] = attn

    # ---- every hidden tile: (tm, C) @ (C, th) -> +b1 -> GELU -> (tm, th) @ (th, C) ----
    inp = ln_ref[...]
    y = jnp.dot(inp, w1_ref[...], preferred_element_type=jnp.float32)
    y = y + b1_ref[...].astype(jnp.float32)

    # GELU (tanh approximation, matching nn.GELU(approximate='tanh')); tanh goes to EUP.
    y = 0.5 * y * (1.0 + jnp.tanh(_GELU_C * (y + 0.044715 * (y * (y * y)))))

    acc_ref[...] += jnp.dot(y.astype(w2_ref.dtype), w2_ref[...],
                            preferred_element_type=jnp.float32)

    # ---- last hidden tile: write the output block (residual already in acc) ----
    @pl.when(h == nh - 1)
    def _():
        o_ref[...] = acc_ref[...].astype(o_ref.dtype)


def _largest_divisor_leq(n, target):
    t = max(1, min(target, n))
    while n % t:
        t -= 1
    return t


def vanilla_execute(x, attn, gamma, beta, w1, b1, w2, *,
                    tile_m=256, tile_h=512,
                    vmem_limit_bytes=64 * 1024 * 1024):
    """x, attn: (B, T, C). gamma/beta: (C,). w1: (C, 4C), b1: (4C,), w2: (4C, C).

    Weights are stored as (in_features, out_features), i.e. the transpose of the
    PyTorch nn.Linear weight layout, so the kernel does plain row-major matmuls.
    W1/W2 may be bf16 for the fast MXU path on v6e/v7x (f32 accumulate is kept).
    """
    B, T, C = x.shape
    H = MLP_SCALE * C
    M = B * T

    # Clamp requested tiles to divisors of the problem (handles toy shapes);
    # at production sizes M and H are multiples of the requested tiles.
    tm = _largest_divisor_leq(M, tile_m)
    th = _largest_divisor_leq(H, tile_h)

    x2 = x.reshape(M, C)
    a2 = attn.reshape(M, C)
    g2 = gamma.reshape(1, C)
    be2 = beta.reshape(1, C)
    b1_2 = b1.reshape(1, H)

    grid = (M // tm, H // th)

    out = pl.pallas_call(
        _vanilla_execute_kernel,
        out_shape=jax.ShapeDtypeStruct((M, C), x.dtype),
        grid_spec=pltpu.PrefetchScalarGridSpec(
            num_scalar_prefetch=0,
            grid=grid,
            in_specs=[
                pl.BlockSpec((tm, C), lambda i, h: (i, 0)),   # x rows
                pl.BlockSpec((tm, C), lambda i, h: (i, 0)),   # attn rows (residual)
                pl.BlockSpec((1, C), lambda i, h: (0, 0)),    # ln gamma
                pl.BlockSpec((1, C), lambda i, h: (0, 0)),    # ln beta
                pl.BlockSpec((C, th), lambda i, h: (0, h)),   # c_fc weight tile (C, th)
                pl.BlockSpec((1, th), lambda i, h: (0, h)),   # c_fc bias tile
                pl.BlockSpec((th, C), lambda i, h: (h, 0)),   # c_proj weight tile (th, C)
            ],
            out_specs=pl.BlockSpec((tm, C), lambda i, h: (i, 0)),
            scratch_shapes=[
                pltpu.VMEM((tm, C), w1.dtype),      # cached LayerNorm output (weight dtype)
                pltpu.VMEM((tm, C), jnp.float32),   # c_proj accumulator (holds residual too)
            ],
        ),
        compiler_params=pltpu.CompilerParams(
            # Row axis sharded across TensorCores (v7x megacore); hidden axis is a
            # reduction carried in the VMEM accumulator -> "arbitrary" and last.
            dimension_semantics=("parallel", "arbitrary"),
            # Explicit VMEM budget: safe on v7x (64 MiB/TC); raise toward ~100 MiB on
            # v5e/v6e if you want bigger tm/th tiles.
            vmem_limit_bytes=vmem_limit_bytes,
        ),
    )(x2, a2, g2, be2, w1, b1_2, w2)

    return out.reshape(B, T, C)


def reference(x, attn, gamma, beta, w1, b1, w2):
    s = x + attn
    mean = jnp.mean(s, axis=-1, keepdims=True)
    var = jnp.mean((s - mean) ** 2, axis=-1, keepdims=True)
    inp = (s - mean) * jax.lax.rsqrt(var + LN_EPS) * gamma + beta
    y = inp @ w1 + b1
    y = 0.5 * y * (1.0 + jnp.tanh(_GELU_C * (y + 0.044715 * y ** 3)))
    return y @ w2 + attn


if __name__ == "__main__":
    B, T, C = 2, 8, 32
    H = MLP_SCALE * C

    key = jax.random.PRNGKey(0)
    kx, ka, kw1, kb1, kw2 = jax.random.split(key, 5)

    x = jax.random.normal(kx, (B, T, C), dtype=jnp.float32)
    attn = jax.random.normal(ka, (B, T, C), dtype=jnp.float32)

    # Deterministic parameter init (shapes follow nn.Linear / nn.LayerNorm in __init__).
    # Weights stored as (in_features, out_features) = PyTorch weight transposed.
    w1 = jax.random.normal(kw1, (C, H), dtype=jnp.float32) * (1.0 / jnp.sqrt(C))
    b1 = jax.random.normal(kb1, (H,), dtype=jnp.float32) * 0.02
    w2 = jax.random.normal(kw2, (H, C), dtype=jnp.float32) * (1.0 / jnp.sqrt(H))
    gamma = jnp.ones((C,), dtype=jnp.float32)   # LayerNorm weight init
    beta = jnp.zeros((C,), dtype=jnp.float32)   # LayerNorm bias init

    out = vanilla_execute(x, attn, gamma, beta, w1, b1, w2)
    out = jax.block_until_ready(out)

    ref = reference(x, attn, gamma, beta, w1, b1, w2)
    assert jnp.allclose(out, ref, atol=1e-4, rtol=1e-4), "mismatch vs JAX reference"

    print("KERNEL_OK")
</pallas_src>

<mosaic_0001>
module attributes {stable_mosaic.version = 11 : i64} {
  func.func @_vanilla_execute_kernel(%arg0: i32, %arg1: i32, %arg2: memref<16x32xf32, #tpu.memory_space<vmem>>, %arg3: memref<16x32xf32, #tpu.memory_space<vmem>>, %arg4: memref<1x32xf32, #tpu.memory_space<vmem>>, %arg5: memref<1x32xf32, #tpu.memory_space<vmem>>, %arg6: memref<32x128xf32, #tpu.memory_space<vmem>>, %arg7: memref<1x128xf32, #tpu.memory_space<vmem>>, %arg8: memref<128x32xf32, #tpu.memory_space<vmem>>, %arg9: memref<16x32xf32, #tpu.memory_space<vmem>>, %arg10: memref<16x32xf32, #tpu.memory_space<vmem>>, %arg11: memref<16x32xf32, #tpu.memory_space<vmem>>) attributes {dimension_semantics = [#tpu.dimension_semantics<parallel>, #tpu.dimension_semantics<arbitrary>], iteration_bounds = array<i64: 1, 1>, scalar_prefetch = 0 : i64, scratch_operands = 2 : i64, tpu.core_type = #tpu.core_type<tc>, window_params = [{transform_indices = @transform_0, window_bounds = array<i64: 16, 32>}, {transform_indices = @transform_1, window_bounds = array<i64: 16, 32>}, {pipeline_mode = #tpu.pipeline_mode<synchronous>, transform_indices = @transform_2, window_bounds = array<i64: 1, 32>}, {pipeline_mode = #tpu.pipeline_mode<synchronous>, transform_indices = @transform_3, window_bounds = array<i64: 1, 32>}, {transform_indices = @transform_4, window_bounds = array<i64: 32, 128>}, {transform_indices = @transform_5, window_bounds = array<i64: 1, 128>}, {transform_indices = @transform_6, window_bounds = array<i64: 128, 32>}, {transform_indices = @transform_7, window_bounds = array<i64: 16, 32>}]} {
    %c0_i32 = arith.constant 0 : i32
    %0 = arith.cmpi eq, %arg1, %c0_i32 : i32
    %1 = arith.extui %0 : i1 to i32
    %c0_i32_0 = arith.constant 0 : i32
    %2 = arith.cmpi ne, %1, %c0_i32_0 : i32
    scf.if %2 {
      %c0_19 = arith.constant 0 : index
      %c0_20 = arith.constant 0 : index
      %30 = vector.load %arg2[%c0_19, %c0_20] : memref<16x32xf32, #tpu.memory_space<vmem>>, vector<16x32xf32>
      %c0_21 = arith.constant 0 : index
      %c0_22 = arith.constant 0 : index
      %31 = vector.load %arg3[%c0_21, %c0_22] : memref<16x32xf32, #tpu.memory_space<vmem>>, vector<16x32xf32>
      %32 = arith.addf %30, %31 : vector<16x32xf32>
      %cst_23 = arith.constant dense<0.000000e+00> : vector<16xf32>
      %33 = vector.multi_reduction <add>, %32, %cst_23 [1] : vector<16x32xf32> to vector<16xf32>
      %34 = vector.shape_cast %33 : vector<16xf32> to vector<16x1xf32>
      %cst_24 = arith.constant 3.200000e+01 : f32
      %35 = vector.broadcast %cst_24 : f32 to vector<16x1xf32>
      %36 = arith.divf %34, %35 : vector<16x1xf32>
      %37 = vector.broadcast %36 : vector<16x1xf32> to vector<16x32xf32>
      %38 = arith.subf %32, %37 : vector<16x32xf32>
      %39 = arith.mulf %38, %38 : vector<16x32xf32>
      %cst_25 = arith.constant dense<0.000000e+00> : vector<16xf32>
      %40 = vector.multi_reduction <add>, %39, %cst_25 [1] : vector<16x32xf32> to vector<16xf32>
      %41 = vector.shape_cast %40 : vector<16xf32> to vector<16x1xf32>
      %cst_26 = arith.constant 3.200000e+01 : f32
      %42 = vector.broadcast %cst_26 : f32 to vector<16x1xf32>
      %43 = arith.divf %41, %42 : vector<16x1xf32>
      %cst_27 = arith.constant 9.99999974E-6 : f32
      %44 = vector.broadcast %cst_27 : f32 to vector<16x1xf32>
      %45 = arith.addf %43, %44 : vector<16x1xf32>
      %46 = math.rsqrt %45 : vector<16x1xf32>
      %47 = vector.broadcast %46 : vector<16x1xf32> to vector<16x32xf32>
      %48 = arith.mulf %38, %47 : vector<16x32xf32>
      %c0_28 = arith.constant 0 : index
      %c0_29 = arith.constant 0 : index
      %49 = vector.load %arg4[%c0_28, %c0_29] : memref<1x32xf32, #tpu.memory_space<vmem>>, vector<1x32xf32>
      %50 = vector.broadcast %49 : vector<1x32xf32> to vector<16x32xf32>
      %51 = arith.mulf %48, %50 : vector<16x32xf32>
      %c0_30 = arith.constant 0 : index
      %c0_31 = arith.constant 0 : index
      %52 = vector.load %arg5[%c0_30, %c0_31] : memref<1x32xf32, #tpu.memory_space<vmem>>, vector<1x32xf32>
      %53 = vector.broadcast %52 : vector<1x32xf32> to vector<16x32xf32>
      %54 = arith.addf %51, %53 : vector<16x32xf32>
      %c0_32 = arith.constant 0 : index
      %c0_33 = arith.constant 0 : index
      %55 = vector.load %arg10[%c0_32, %c0_33] : memref<16x32xf32, #tpu.memory_space<vmem>>, vector<16x32xf32>
      tpu.vector_store %arg10[%c0_32, %c0_33], %54 {strides = array<i32>} : memref<16x32xf32, #tpu.memory_space<vmem>>, vector<16x32xf32>,
      %c0_34 = arith.constant 0 : index
      %c0_35 = arith.constant 0 : index
      %56 = vector.load %arg11[%c0_34, %c0_35] : memref<16x32xf32, #tpu.memory_space<vmem>>, vector<16x32xf32>
      tpu.vector_store %arg11[%c0_34, %c0_35], %31 {strides = array<i32>} : memref<16x32xf32, #tpu.memory_space<vmem>>, vector<16x32xf32>,
    } else {
    }
    %c0 = arith.constant 0 : index
    %c0_1 = arith.constant 0 : index
    %3 = vector.load %arg10[%c0, %c0_1] : memref<16x32xf32, #tpu.memory_space<vmem>>, vector<16x32xf32>
    %c0_2 = arith.constant 0 : index
    %c0_3 = arith.constant 0 : index
    %4 = vector.load %arg6[%c0_2, %c0_3] : memref<32x128xf32, #tpu.memory_space<vmem>>, vector<32x128xf32>
    %cst = arith.constant dense<0.000000e+00> : vector<16x128xf32>
    %5 = tpu.matmul %3, %4, %cst {dimension_numbers = #tpu.dot_dimension_numbers<[1], [0], [0], [1], [0, 0, 1, 1], [], []>} : vector<16x32xf32>, vector<32x128xf32>, vector<16x128xf32> -> vector<16x128xf32>
    %c0_4 = arith.constant 0 : index
    %c0_5 = arith.constant 0 : index
    %6 = vector.load %arg7[%c0_4, %c0_5] : memref<1x128xf32, #tpu.memory_space<vmem>>, vector<1x128xf32>
    %7 = vector.broadcast %6 : vector<1x128xf32> to vector<16x128xf32>
    %8 = arith.addf %5, %7 : vector<16x128xf32>
    %cst_6 = arith.constant 5.000000e-01 : f32
    %9 = vector.broadcast %cst_6 : f32 to vector<16x128xf32>
    %10 = arith.mulf %9, %8 : vector<16x128xf32>
    %11 = arith.mulf %8, %8 : vector<16x128xf32>
    %12 = arith.mulf %8, %11 : vector<16x128xf32>
    %cst_7 = arith.constant 4.471500e-02 : f32
    %13 = vector.broadcast %cst_7 : f32 to vector<16x128xf32>
    %14 = arith.mulf %13, %12 : vector<16x128xf32>
    %15 = arith.addf %8, %14 : vector<16x128xf32>
    %cst_8 = arith.constant 0.797884583 : f32
    %16 = vector.broadcast %cst_8 : f32 to vector<16x128xf32>
    %17 = arith.mulf %16, %15 : vector<16x128xf32>
    %18 = math.tanh %17 : vector<16x128xf32>
    %cst_9 = arith.constant 1.000000e+00 : f32
    %19 = vector.broadcast %cst_9 : f32 to vector<16x128xf32>
    %20 = arith.addf %19, %18 : vector<16x128xf32>
    %21 = arith.mulf %10, %20 : vector<16x128xf32>
    %c0_10 = arith.constant 0 : index
    %c0_11 = arith.constant 0 : index
    %22 = vector.load %arg11[%c0_10, %c0_11] : memref<16x32xf32, #tpu.memory_space<vmem>>, vector<16x32xf32>
    %c0_12 = arith.constant 0 : index
    %c0_13 = arith.constant 0 : index
    %23 = vector.load %arg8[%c0_12, %c0_13] : memref<128x32xf32, #tpu.memory_space<vmem>>, vector<128x32xf32>
    %cst_14 = arith.constant dense<0.000000e+00> : vector<16x32xf32>
    %24 = tpu.matmul %21, %23, %cst_14 {dimension_numbers = #tpu.dot_dimension_numbers<[1], [0], [0], [1], [0, 0, 1, 1], [], []>} : vector<16x128xf32>, vector<128x32xf32>, vector<16x32xf32> -> vector<16x32xf32>
    %25 = arith.addf %22, %24 : vector<16x32xf32>
    %c0_15 = arith.constant 0 : index
    %c0_16 = arith.constant 0 : index
    %26 = vector.load %arg11[%c0_15, %c0_16] : memref<16x32xf32, #tpu.memory_space<vmem>>, vector<16x32xf32>
    tpu.vector_store %arg11[%c0_15, %c0_16], %25 {strides = array<i32>} : memref<16x32xf32, #tpu.memory_space<vmem>>, vector<16x32xf32>,
    %c0_i32_17 = arith.constant 0 : i32
    %27 = arith.cmpi eq, %arg1, %c0_i32_17 : i32
    %28 = arith.extui %27 : i1 to i32
    %c0_i32_18 = arith.constant 0 : i32
    %29 = arith.cmpi ne, %28, %c0_i32_18 : i32
    scf.if %29 {
      %c0_19 = arith.constant 0 : index
      %c0_20 = arith.constant 0 : index
      %30 = vector.load %arg11[%c0_19, %c0_20] : memref<16x32xf32, #tpu.memory_space<vmem>>, vector<16x32xf32>
      %c0_21 = arith.constant 0 : index
      %c0_22 = arith.constant 0 : index
      %31 = vector.load %arg9[%c0_21, %c0_22] : memref<16x32xf32, #tpu.memory_space<vmem>>, vector<16x32xf32>
      tpu.vector_store %arg9[%c0_21, %c0_22], %30 {strides = array<i32>} : memref<16x32xf32, #tpu.memory_space<vmem>>, vector<16x32xf32>,
    } else {
    }
    return
  }
  func.func @transform_0(%arg0: i32, %arg1: i32) -> (i32, i32) {
    %c0_i32 = arith.constant 0 : i32
    %c0_i32_0 = arith.constant 0 : i32
    return %arg0, %c0_i32 : i32, i32
  }
  func.func @transform_1(%arg0: i32, %arg1: i32) -> (i32, i32) {
    %c0_i32 = arith.constant 0 : i32
    %c0_i32_0 = arith.constant 0 : i32
    return %arg0, %c0_i32 : i32, i32
  }
  func.func @transform_2(%arg0: i32, %arg1: i32) -> (i32, i32) {
    %c0_i32 = arith.constant 0 : i32
    %c0_i32_0 = arith.constant 0 : i32
    %c0_i32_1 = arith.constant 0 : i32
    return %c0_i32, %c0_i32_0 : i32, i32
  }
  func.func @transform_3(%arg0: i32, %arg1: i32) -> (i32, i32) {
    %c0_i32 = arith.constant 0 : i32
    %c0_i32_0 = arith.constant 0 : i32
    %c0_i32_1 = arith.constant 0 : i32
    return %c0_i32, %c0_i32_0 : i32, i32
  }
  func.func @transform_4(%arg0: i32, %arg1: i32) -> (i32, i32) {
    %c0_i32 = arith.constant 0 : i32
    %c0_i32_0 = arith.constant 0 : i32
    return %c0_i32, %arg1 : i32, i32
  }
  func.func @transform_5(%arg0: i32, %arg1: i32) -> (i32, i32) {
    %c0_i32 = arith.constant 0 : i32
    %c0_i32_0 = arith.constant 0 : i32
    return %c0_i32, %arg1 : i32, i32
  }
  func.func @transform_6(%arg0: i32, %arg1: i32) -> (i32, i32) {
    %c0_i32 = arith.constant 0 : i32
    %c0_i32_0 = arith.constant 0 : i32
    return %arg1, %c0_i32 : i32, i32
  }
  func.func @transform_7(%arg0: i32, %arg1: i32) -> (i32, i32) {
    %c0_i32 = arith.constant 0 : i32
    %c0_i32_0 = arith.constant 0 : i32
    return %arg0, %c0_i32 : i32, i32
  }
}

</mosaic_0001>

<bundles_post_ra>
// kernel: tpu_custom_call.1
= control target key start
LH: loop header
LB: loop body
LE: loop exit
PB: predicated region body
PF: predicated region fallthrough
CT: control target
= control target key end

     0   :  { %vm37_vm0 = vcmask 261120   ;;  %s569_s0 = inlined_call_operand.vmem [shape: f32[16,32], index: 0, kind: input, shape index: {}]   ;;  %s570_s1 = inlined_call_operand.vmem [shape: f32[16,32], index: 1, kind: input, shape index: {}]   ;;  %s571_s2 = inlined_call_operand.vmem [shape: f32[1,32], index: 2, kind: input, shape index: {}]   ;;  %s572_s3 = inlined_call_operand.vmem [shape: f32[1,32], index: 3, kind: input, shape index: {}]   ;;  %s573_s4 = inlined_call_operand.vmem [shape: f32[32,128], index: 4, kind: input, shape index: {}]   ;;  %s574_s5 = inlined_call_operand.vmem [shape: f32[1,128], index: 5, kind: input, shape index: {}]   ;;  %s575_s6 = inlined_call_operand.vmem [shape: f32[128,32], index: 6, kind: input, shape index: {}]   ;;  %s576_s7 = inlined_call_operand.hbm [shape: f32[16,32], index: 7, kind: output, shape index: {}]  }
   0x1   :  { %v31_v0 = vld [vmem:[%s569_s0] sm:$0xff]  ;;  %v32_v2 = vld [vmem:[%s569_s0 + $0x8] sm:$0xff] }
   0x2   :  { %v33_v1 = vld [vmem:[%s570_s1] sm:$0xff]  ;;  %v34_v4 = vld [vmem:[%s570_s1 + $0x8] sm:$0xff] }
   0x3   :  { %v35_v3 = vadd.f32 %v33_v1, %v31_v0  ;;  %85 = vst.msk [vmem:[#allocation3] sm:$0xff] %vm37_vm0, %v33_v1 }
   0x4   :  { %12 = vsyncpa [#allocation5], 0  ;;  %v36_v5 = vadd.f32 %v34_v4, %v32_v2  ;;  %86 = vst.msk [vmem:[#allocation3 + $0x8] sm:$0xff] %vm37_vm0, %v34_v4  ;;  %v92_v18 = vld [vmem:[%s573_s4 + $0x18] sm:$0xff]  ;;  %v91_v19 = vld [vmem:[%s573_s4 + $0x10] sm:$0xff] }
   0x5   :  { %v38_v6 = vsel %vm37_vm0, %v35_v3, 0.0  ;;  %349 = vmatprep.subr.mxu0 %v92_v18  ;;  %v90_v20 = vld [vmem:[%s573_s4 + $0x8] sm:$0xff]  ;;  %v89_v21 = vld [vmem:[%s573_s4] sm:$0xff]  ;;  %v217_v40 = vld [vmem:[%s575_s6 + $0x78] sm:$0xff] }
   0x6   :  { %39 = vadd.xlane.f32.xlu0 %v38_v6  ;;  %v41_v7 = vsel %vm37_vm0, %v36_v5, 0.0  ;;  %350 = vmatpush3.msra.mxu0 %v92_v18  ;;  %v320_v29 = vld [vmem:[%s571_s2] ss:$0 sm:$0xff]  ;;  %v216_v41 = vld [vmem:[%s575_s6 + $0x70] sm:$0xff]  ;;  %v215_v42 = vld [vmem:[%s575_s6 + $0x68] sm:$0xff] }
   0x7   :  { %351 = vmatprep.subr.mxu0 %v91_v19  ;;  %v321_v31 = vld [vmem:[%s572_s3] ss:$0 sm:$0xff]  ;;  %360 = vmatprep.subr.mxu1 %v217_v40  ;;  %v213_v44 = vld [vmem:[%s575_s6 + $0x58] sm:$0xff]  ;;  %v212_v45 = vld [vmem:[%s575_s6 + $0x50] sm:$0xff] }
   0x8   :  { %352 = vmatpush3.msra.mxu0 %v91_v19  ;;  %361 = vmatpush3.msra.mxu1 %v217_v40  ;;  %v214_v43 = vld [vmem:[%s575_s6 + $0x60] sm:$0xff]  ;;  %v211_v46 = vld [vmem:[%s575_s6 + $0x48] sm:$0xff]  ;;  %v209_v48 = vld [vmem:[%s575_s6 + $0x38] sm:$0xff] }
   0x9   :  { %353 = vmatprep.subr.mxu0 %v90_v20  ;;  %362 = vmatprep.subr.mxu1 %v216_v41  ;;  %v210_v47 = vld [vmem:[%s575_s6 + $0x40] sm:$0xff]  ;;  %v208_v49 = vld [vmem:[%s575_s6 + $0x30] sm:$0xff]  ;;  %v207_v50 = vld [vmem:[%s575_s6 + $0x28] sm:$0xff] }
   0xa   :  { %42 = vadd.xlane.f32.xlu0 %v41_v7  ;;  %354 = vmatpush3.msra.mxu0 %v90_v20  ;;  %v206_v51 = vld [vmem:[%s575_s6 + $0x20] sm:$0xff]  ;;  %v205_v52 = vld [vmem:[%s575_s6 + $0x18] sm:$0xff]  ;;  %v204_v53 = vld [vmem:[%s575_s6 + $0x10] sm:$0xff] }
   0xb   :  { %355 = vmatprep.subr.mxu0 %v89_v21  ;;  %363 = vmatpush3.msra.mxu1 %v216_v41  ;;  %v203_v54 = vld [vmem:[%s575_s6 + $0x8] sm:$0xff]  ;;  %v202_v55 = vld [vmem:[%s575_s6] sm:$0xff] }
   0xc   :  { %356 = vmatpush3.msra.mxu0 %v89_v21  ;;  %364 = vmatprep.subr.mxu1 %v215_v42  ;;  %v322_v56 = vld [vmem:[%s574_s5] ss:$0 sm:$0xff]  ;;  %s428_s5 = smov [#allocation4]  }
   0xd   :  { %365 = vmatpush3.msra.mxu1 %v215_v42  ;;  %s309_s6 = sshll.u32 %s428_s5, 4  ;;  %s310_s6 = int_to_ptr.vmem [resolvable:$true] %s309_s6 }
   0xe   :  { %366 = vmatprep.subr.mxu1 %v214_v43  ;;  %s406_s22 = scalar_lea.vmem %s310_s6, 256  ;;  %p411_p1 = scmp.lt.s32.totalorder %s310_s6, %s310_s6 }
   0xf   :  { %367 = vmatpush3.msra.mxu1 %v214_v43  ;;  %p407_p0 = scmp.ne.s32.totalorder %s310_s6, %s406_s22  ;;  %p412_p2 = scmp.lt.s32.totalorder %s406_s22, %s406_s22 }
  0x10   :  { %368 = vmatprep.subr.mxu1 %v213_v44 }
  0x11   :  { %369 = vmatpush3.msra.mxu1 %v213_v44  ;;  %p413_p3 = por %p412_p2, %p411_p1 }
  0x12   :  { %370 = vmatprep.subr.mxu1 %v212_v45 }
  0x13   :  { %371 = vmatpush3.msra.mxu1 %v212_v45  ;;  %p414_p4 = pnand %p413_p3, %p407_p0 }
  0x14   :  { %372 = vmatprep.subr.mxu1 %v211_v46 }
  0x15   :  { %373 = vmatpush3.msra.mxu1 %v211_v46 }
  0x16   :  { %374 = vmatprep.subr.mxu1 %v210_v47 }
  0x17   :  { %375 = vmatpush3.msra.mxu1 %v210_v47 }
  0x18   :  { %376 = vmatprep.subr.mxu1 %v209_v48 }
  0x19   :  { %377 = vmatpush3.msra.mxu1 %v209_v48 }
  0x1a   :  { %378 = vmatprep.subr.mxu1 %v208_v49 }
  0x1b   :  { %379 = vmatpush3.msra.mxu1 %v208_v49 }
  0x1c   :  { %380 = vmatprep.subr.mxu1 %v207_v50 }
  0x1d   :  { %381 = vmatpush3.msra.mxu1 %v207_v50 }
  0x1e   :  { %382 = vmatprep.subr.mxu1 %v206_v51 }
  0x1f   :  { %383 = vmatpush3.msra.mxu1 %v206_v51 }
  0x20   :  { %384 = vmatprep.subr.mxu1 %v205_v52 }
  0x21   :  { %385 = vmatpush3.msra.mxu1 %v205_v52 }
  0x22   :  { %386 = vmatprep.subr.mxu1 %v204_v53 }
  0x23   :  { %387 = vmatpush3.msra.mxu1 %v204_v53 }
  0x24   :  { %388 = vmatprep.subr.mxu1 %v203_v54 }
  0x25   :  { %389 = vmatpush3.msra.mxu1 %v203_v54 }
  0x26   :  { %390 = vmatprep.subr.mxu1 %v202_v55 }
  0x27   :  { %391 = vmatpush3.msra.mxu1 %v202_v55 }
  0x8f   :  { %v40_v8 = vpop.xlane.xlu0 %39 }
  0x90   :  { %v45_v9 = vmul.f32 0.03125, %v40_v8 }
  0x92   :  { %v47_v10 = vsub.f32 %v35_v3, %v45_v9 }
  0x93   :  { %v43_v11 = vpop.xlane.xlu0 %42 }
  0x94   :  { %v46_v12 = vmul.f32 0.03125, %v43_v11  ;;  %v49_v13 = vmul.f32 %v47_v10, %v47_v10 }
  0x96   :  { %v48_v14 = vsub.f32 %v36_v5, %v46_v12  ;;  %v51_v15 = vsel %vm37_vm0, %v49_v13, 0.0 }
  0x97   :  { %52 = vadd.xlane.f32.xlu1 %v51_v15  ;;  %v201_v15 = vld [vmem:[#allocation3 + $0x8] sm:$0xff] }
  0x98   :  { %v50_v16 = vmul.f32 %v48_v14, %v48_v14 }
  0x9a   :  { %v54_v17 = vsel %vm37_vm0, %v50_v16, 0.0 }
  0x9b   :  { %55 = vadd.xlane.f32.xlu1 %v54_v17  ;;  %v200_v17 = vld [vmem:[#allocation3] sm:$0xff] }
 0x120   :  { %v53_v22 = vpop.xlane.xlu1 %52 }
 0x121   :  { %v57_v23 = vmul.f32 0.03125, %v53_v22 }
 0x123   :  { %v59_v24 = vadd.f32 1e-05, %v57_v23 }
 0x124   :  { %v56_v25 = vpop.xlane.xlu1 %55 }
 0x125   :  { %398 = vrsqrt.f32 %v59_v24  ;;  %v58_v26 = vmul.f32 0.03125, %v56_v25 }
 0x127   :  { %v60_v27 = vadd.f32 1e-05, %v58_v26 }
 0x129   :  { %400 = vrsqrt.f32 %v60_v27 }
 0x132   :  { %v399_v28 = vpop.eup %398 }
 0x133   :  { %v63_v30 = vmul.f32 %v399_v28, %v47_v10 }
 0x135   :  { %v72_v32 = vmul.f32 %v320_v29, %v63_v30 }
 0x136   :  { %v401_v33 = vpop.eup %400 }
 0x137   :  { %v81_v34 = vadd.f32 %v321_v31, %v72_v32  ;;  %v64_v35 = vmul.f32 %v401_v33, %v48_v14 }
 0x139   :  { %83 = vst.msk [vmem:[#allocation2] sm:$0xff] %vm37_vm0, %v81_v34  ;;  %v73_v36 = vmul.f32 %v320_v29, %v64_v35 }
 0x13b   :  { %v82_v37 = vadd.f32 %v321_v31, %v73_v36 }
 0x13d   :  { %84 = vst.msk [vmem:[#allocation2 + $0x8] sm:$0xff] %vm37_vm0, %v82_v37 }
 0x140   :  { %v87_v38 = vld [vmem:[#allocation2] sm:$0xff] }
 0x141   :  { %357 = vmatprep.mubr.msk.f32.mxu0 %vm37_vm0, %v87_v38 }
 0x144   :  { %v88_v39 = vld [vmem:[#allocation2 + $0x8] sm:$0xff] }
 0x145   :  { %358 = vmatmul.mubr.msk.f32.vlgmr.msra.gmra.mxu0 %vm37_vm0, %v88_v39 }
 0x205   :  { %v359_v57 = vpop.f32.mrf.mxu0 }
 0x206   :  { %v179_v58 = vadd.f32 %v359_v57, %v322_v56 }
 0x207   :  { %v173_v59 = vpop.f32.mrf.mxu0 }
 0x208   :  { %v185_v60 = vmul.f32 %v179_v58, %v179_v58  ;;  %v174_v61 = vadd.f32 %v322_v56, %v173_v59  ;;  %v183_v12 = vmul.f32 0.5, %v179_v58 }
 0x20a   :  { %v187_v62 = vmul.f32 %v185_v60, %v179_v58  ;;  %v184_v63 = vmul.f32 %v174_v61, %v174_v61  ;;  %v182_v10 = vmul.f32 0.5, %v174_v61 }
 0x20c   :  { %v189_v0 = vmul.f32 0.044715, %v187_v62  ;;  %v186_v1 = vmul.f32 %v184_v63, %v174_v61 }
 0x20e   :  { %v191_v2 = vadd.f32 %v189_v0, %v179_v58  ;;  %v188_v3 = vmul.f32 0.044715, %v186_v1 }
 0x210   :  { %v193_v4 = vmul.f32 0.7978846, %v191_v2  ;;  %v190_v5 = vadd.f32 %v188_v3, %v174_v61 }
 0x212   :  { %v192_v6 = vmul.f32 0.7978846, %v190_v5  ;;  %402 = vtanh.f32 %v193_v4 }
 0x214   :  { %404 = vtanh.f32 %v192_v6 }
 0x21f   :  { %v403_v7 = vpop.eup %402 }
 0x220   :  { %v197_v9 = vadd.f32 1.0, %v403_v7 }
 0x221   :  { %v405_v8 = vpop.eup %404 }
 0x222   :  { %v196_v11 = vadd.f32 1.0, %v405_v8  ;;  %v199_v14 = vmul.f32 %v197_v9, %v183_v12 }
 0x224   :  { %v198_v13 = vmul.f32 %v196_v11, %v182_v10 }
 0x226   :  { %392 = vmatprep.mubr.f32.mxu1 %v198_v13 }
 0x227   :  { %393 = vmatmul.mubr.f32.vlgmr.msra.gmra.mxu1 %v199_v14 }
 0x2e7   :  { %v394_v16 = vpop.f32.mrf.mxu1 }
 0x2e8   :  { %v294_v18 = vadd.f32 %v394_v16, %v201_v15 }
 0x2e9   :  { %v284_v19 = vpop.f32.mrf.mxu1 }
 0x2ea   :  { %296 = vst.msk [vmem:[#allocation3 + $0x8] sm:$0xff] %vm37_vm0, %v294_v18  ;;  %v293_v20 = vadd.f32 %v284_v19, %v200_v17 }
 0x2ec   :  { %295 = vst.msk [vmem:[#allocation3] sm:$0xff] %vm37_vm0, %v293_v20 }
 0x2f1   :  { %v301_v21 = vld [vmem:[#allocation3 + $0x8] sm:$0xff] }
 0x2f2   :  { %303 = vst.msk [vmem:[#allocation4 + $0x8] sm:$0xff] %vm37_vm0, %v301_v21 }
 0x2f3   :  { %v300_v22 = vld [vmem:[#allocation3] sm:$0xff] }
 0x2f4   :  { %302 = vst.msk [vmem:[#allocation4] sm:$0xff] %vm37_vm0, %v300_v22 }
 0x2f5   :  { %417 = shalt.err (!%p414_p4)
}
 0x2f6   :  { %s429_s23 = smov 128   ;;  %s430_s24 = smov 8  }
 0x2f7   :  { %315 = dma.vmem_to_hbm [thread:$0]  %s310_s6, 256, %s576_s7, [#allocation5], %s429_s23, %s429_s23, %s430_s24  }
 0x2f8   :  { %426 = dma.done.wait [#allocation5], 256  }
 0x2f9   :  { %427 = vsyncadd [#allocation5], 4294967040 }
 0x2fa   :  { %319 = vsyncpa [#allocation5], 1 }

</bundles_post_ra>
